<compile_context>
chip_gen: v6e
topology: v6e:2x2x1
jax: 0.10.0
libtpu: 0.0.40
codegen_flags: <defaults>
</compile_context>

<pallas_src>
import jax
import jax.numpy as jnp
from jax import lax
from jax.experimental import pallas as pl
from jax.experimental.pallas import tpu as pltpu


def yolo_matmul_kernel(p_ref, w_ref, b_ref, o_ref):
    # p_ref: (TM, KP)  im2col patch rows (K = 9*Cin, zero-padded lanes)
    # w_ref: (KP, CP)  conv weights with BN scale folded (zero-padded rows/cols)
    # b_ref: (1,  CP)  folded BN bias (zero in padded channels)
    # o_ref: (TM, CP)  lane-dense output tile
    y = jnp.dot(p_ref[...], w_ref[...], preferred_element_type=jnp.float32)
    y = y + b_ref[...]
    y = jnp.where(y > 0.0, y, 0.1 * y)        # LeakyReLU(0.1)
    o_ref[...] = y.astype(o_ref.dtype)        # single dense store, no scratch


def yolo_block(x_nchw, w_oihw, gamma, beta, running_mean, running_var,
               eps=1e-5, tm=128):
    """Conv2d(3x3, pad=1, no bias) + BatchNorm2d (inference) + LeakyReLU(0.1)."""
    N, Cin, H, W = x_nchw.shape
    Cout = w_oihw.shape[0]
    K = 9 * Cin
    KP = ((K + 127) // 128) * 128             # lane-dense contraction depth
    CP = ((Cout + 127) // 128) * 128          # lane-dense output channels
    M = N * H * W
    MP = ((M + tm - 1) // tm) * tm            # row-tile aligned

    # Fold inference-mode BN into the conv: scale into weights, bias kept.
    scale = gamma / jnp.sqrt(running_var + eps)
    bias = beta - running_mean * scale

    # OIHW -> (dy, dx, cin) x cout, BN scale folded, padded to (KP, CP).
    w_hwio = jnp.transpose(w_oihw, (2, 3, 1, 0)) * scale[None, None, None, :]
    w_mat = jnp.pad(w_hwio.reshape(K, Cout), ((0, KP - K), (0, CP - Cout)))
    bias_p = jnp.pad(bias, (0, CP - Cout)).reshape(1, CP)

    # im2col patch matrix (M, K) -> zero-padded (MP, KP); (dy, dx, cin) ordering
    # matches the weight reshape above.  NCHW interface forces this layout glue;
    # for a production NHWC pipeline this moves inside the kernel (see TODO).
    x_nhwc = jnp.transpose(x_nchw, (0, 2, 3, 1))
    xp = jnp.pad(x_nhwc, ((0, 0), (1, 1), (1, 1), (0, 0)))
    cols = [xp[:, dy:dy + H, dx:dx + W, :]
            for dy in range(3) for dx in range(3)]
    patches = jnp.concatenate(cols, axis=-1).reshape(M, K)
    patches = jnp.pad(patches, ((0, MP - M), (0, KP - K)))

    out_flat = pl.pallas_call(
        yolo_matmul_kernel,
        out_shape=jax.ShapeDtypeStruct((MP, CP), x_nchw.dtype),
        grid=(MP // tm,),
        in_specs=[
            pl.BlockSpec((tm, KP), lambda i: (i, 0)),   # patch row-tile
            pl.BlockSpec((KP, CP), lambda i: (0, 0)),   # weights, VMEM-resident
            pl.BlockSpec((1, CP), lambda i: (0, 0)),    # bias, VMEM-resident
        ],
        out_specs=pl.BlockSpec((tm, CP), lambda i: (i, 0)),
        compiler_params=pltpu.CompilerParams(
            dimension_semantics=("parallel",)),
    )(patches, w_mat, bias_p)

    # Drop padded rows/channels, back to NCHW to match the PyTorch module.
    out_nhwc = out_flat[:M, :Cout].reshape(N, H, W, Cout)
    return jnp.transpose(out_nhwc, (0, 3, 1, 2))


if __name__ == "__main__":
    # Small shapes consistent with the module: batch=2, in_channels=4,
    # out_channels=8, spatial 16x16.
    N, Cin, Cout, H, W = 2, 4, 8, 16, 16
    eps = 1e-5

    key = jax.random.PRNGKey(0)
    kx, kw, kg, kb, km, kv = jax.random.split(key, 6)

    # PyTorch-style NCHW input and OIHW conv weight.
    x_nchw = jax.random.normal(kx, (N, Cin, H, W), jnp.float32)
    w_oihw = 0.1 * jax.random.normal(kw, (Cout, Cin, 3, 3), jnp.float32)

    # Deterministic synthetic BatchNorm parameters (inference mode).
    gamma = 1.0 + 0.1 * jax.random.normal(kg, (Cout,), jnp.float32)
    beta = 0.1 * jax.random.normal(kb, (Cout,), jnp.float32)
    running_mean = 0.1 * jax.random.normal(km, (Cout,), jnp.float32)
    running_var = jax.random.uniform(kv, (Cout,), jnp.float32,
                                     minval=0.5, maxval=1.5)

    out = yolo_block(x_nchw, w_oihw, gamma, beta, running_mean, running_var, eps)
    out = jax.block_until_ready(out)

    # Pure-JAX reference.
    x_nhwc = jnp.transpose(x_nchw, (0, 2, 3, 1))
    w_hwio = jnp.transpose(w_oihw, (2, 3, 1, 0))
    conv_ref = lax.conv_general_dilated(
        x_nhwc, w_hwio, window_strides=(1, 1), padding="SAME",
        dimension_numbers=("NHWC", "HWIO", "NHWC"))
    scale = gamma / jnp.sqrt(running_var + eps)
    bias = beta - running_mean * scale
    y_ref = conv_ref * scale + bias
    y_ref = jnp.where(y_ref > 0, y_ref, 0.1 * y_ref)
    y_ref_nchw = jnp.transpose(y_ref, (0, 3, 1, 2))

    assert out.shape == (N, Cout, H, W)
    assert jnp.allclose(out, y_ref_nchw, rtol=1e-4, atol=1e-4)

    print("KERNEL_OK")
</pallas_src>

<mosaic_0001>
module attributes {stable_mosaic.version = 11 : i64} {
  func.func @yolo_matmul_kernel(%arg0: i32, %arg1: memref<128x128xf32, #tpu.memory_space<vmem>>, %arg2: memref<128x128xf32, #tpu.memory_space<vmem>>, %arg3: memref<1x128xf32, #tpu.memory_space<vmem>>, %arg4: memref<128x128xf32, #tpu.memory_space<vmem>>) attributes {dimension_semantics = [#tpu.dimension_semantics<parallel>], iteration_bounds = array<i64: 4>, scalar_prefetch = 0 : i64, scratch_operands = 0 : i64, tpu.core_type = #tpu.core_type<tc>, window_params = [{transform_indices = @transform_0, window_bounds = array<i64: 128, 128>}, {pipeline_mode = #tpu.pipeline_mode<synchronous>, transform_indices = @transform_1, window_bounds = array<i64: 128, 128>}, {pipeline_mode = #tpu.pipeline_mode<synchronous>, transform_indices = @transform_2, window_bounds = array<i64: 1, 128>}, {transform_indices = @transform_3, window_bounds = array<i64: 128, 128>}]} {
    %c0 = arith.constant 0 : index
    %c0_0 = arith.constant 0 : index
    %0 = vector.load %arg1[%c0, %c0_0] : memref<128x128xf32, #tpu.memory_space<vmem>>, vector<128x128xf32>
    %c0_1 = arith.constant 0 : index
    %c0_2 = arith.constant 0 : index
    %1 = vector.load %arg2[%c0_1, %c0_2] : memref<128x128xf32, #tpu.memory_space<vmem>>, vector<128x128xf32>
    %cst = arith.constant dense<0.000000e+00> : vector<128x128xf32>
    %2 = tpu.matmul %0, %1, %cst {dimension_numbers = #tpu.dot_dimension_numbers<[1], [0], [0], [1], [0, 0, 1, 1], [], []>} : vector<128x128xf32>, vector<128x128xf32>, vector<128x128xf32> -> vector<128x128xf32>
    %c0_3 = arith.constant 0 : index
    %c0_4 = arith.constant 0 : index
    %3 = vector.load %arg3[%c0_3, %c0_4] : memref<1x128xf32, #tpu.memory_space<vmem>>, vector<1x128xf32>
    %4 = vector.broadcast %3 : vector<1x128xf32> to vector<128x128xf32>
    %5 = arith.addf %2, %4 : vector<128x128xf32>
    %cst_5 = arith.constant 0.000000e+00 : f32
    %6 = vector.broadcast %cst_5 : f32 to vector<128x128xf32>
    %7 = arith.cmpf ogt, %5, %6 : vector<128x128xf32>
    %cst_6 = arith.constant 1.000000e-01 : f32
    %8 = vector.broadcast %cst_6 : f32 to vector<128x128xf32>
    %9 = arith.mulf %8, %5 : vector<128x128xf32>
    %10 = arith.select %7, %5, %9 : vector<128x128xi1>, vector<128x128xf32>
    %c0_7 = arith.constant 0 : index
    %c0_8 = arith.constant 0 : index
    %11 = vector.load %arg4[%c0_7, %c0_8] : memref<128x128xf32, #tpu.memory_space<vmem>>, vector<128x128xf32>
    tpu.vector_store %arg4[%c0_7, %c0_8], %10 {strides = array<i32>} : memref<128x128xf32, #tpu.memory_space<vmem>>, vector<128x128xf32>,
    return
  }
  func.func @transform_0(%arg0: i32) -> (i32, i32) {
    %c0_i32 = arith.constant 0 : i32
    %c0_i32_0 = arith.constant 0 : i32
    return %arg0, %c0_i32 : i32, i32
  }
  func.func @transform_1(%arg0: i32) -> (i32, i32) {
    %c0_i32 = arith.constant 0 : i32
    %c0_i32_0 = arith.constant 0 : i32
    %c0_i32_1 = arith.constant 0 : i32
    return %c0_i32, %c0_i32_0 : i32, i32
  }
  func.func @transform_2(%arg0: i32) -> (i32, i32) {
    %c0_i32 = arith.constant 0 : i32
    %c0_i32_0 = arith.constant 0 : i32
    %c0_i32_1 = arith.constant 0 : i32
    return %c0_i32, %c0_i32_0 : i32, i32
  }
  func.func @transform_3(%arg0: i32) -> (i32, i32) {
    %c0_i32 = arith.constant 0 : i32
    %c0_i32_0 = arith.constant 0 : i32
    return %arg0, %c0_i32 : i32, i32
  }
}

</mosaic_0001>

<bundles_post_ra>
// kernel: tpu_custom_call.1
= control target key start
LH: loop header
LB: loop body
LE: loop exit
PB: predicated region body
PF: predicated region fallthrough
CT: control target
= control target key end

     0   :  { %8 = vsyncpa [#allocation3], 0  ;;  %s1145_s0 = inlined_call_operand.hbm [shape: f32[512,128], index: 0, kind: input, shape index: {}]   ;;  %s1146_s1 = inlined_call_operand.hbm [shape: f32[128,128], index: 1, kind: input, shape index: {}]   ;;  %s1147_s2 = inlined_call_operand.vmem [shape: f32[1,128], index: 2, kind: input, shape index: {}]   ;;  %s1148_s3 = inlined_call_operand.hbm [shape: f32[512,128], index: 3, kind: output, shape index: {}]  }
   0x1   :  { %10 = vsyncpa [#allocation3 + $0x1], 0 }
   0x2   :  { %11 = vsyncpa [#allocation6], 0 }
   0x3   :  { %12 = vsyncpa [#allocation4], 0 }
   0x4   :  { %14 = vsyncpa [#allocation4 + $0x1], 0  ;;  %s902_s12 = smov 0   ;;  %s904_s13 = smov 0  }
   0x5   :  { %s906_s14 = smov 0   ;;  %s908_s15 = smov 0  }
   0x6 LB: > { %s923_s16 = sadd.s32 4294967295, %s873_s15   ;;  %s551_s17 = sadd.s32 4294967294, %s873_s15   ;;  %s873_s15 = sphi %s908_s15, %s1169_s15   ;;  %s869_s14 = sphi %s906_s14, %s1168_s14   ;;  %s865_s13 = sphi %s904_s13, %s1167_s13   ;;  %s861_s12 = sphi %s902_s12, %s1166_s12  }
   0x7   : > { %p40_p0 = scmp.ne.s32.totalorder %s865_s13, %s861_s12  ;;  %p1149_p1 = scmp.eq.s32.totalorder %s923_s16, 0 }
   0x8   : > { %p112_p3 = scmp.eq.s32.totalorder %s551_s17, 3  ;;  %p552_p5 = scmp.ge.s32.totalorder %s873_s15, 1 }
   0x9   : > { %p932_p4 = por %p1149_p1, %p40_p0  ;;  %p119_p7 = scmp.lt.s32.totalorder %s873_s15, 5 }
   0xa   : > { %p937_p6 = por %p112_p3, %p40_p0  ;;  %s875_s21 = smov [#allocation5]  }
   0xb   : > { %s1153_s18 = scalar_select %p932_p4, 1, 0 }
   0xc   : > { %s1154_s19 = scalar_select %p937_p6, 1, 0 }
   0xd   : > { %p942_p8 = pnand %p552_p5, %p119_p7  ;;  %s131_s22 = sshll.u32 %s875_s21, 4  ;;  %s132_s22 = int_to_ptr.vmem [resolvable:$true] %s131_s22 }
   0xe   : > { %s955_s24 = sadd.s32 1, %s873_s15   ;;  %s27_s25 = sadd.s32 1, %s869_s14 }
   0xf   : > { %s1155_s20 = scalar_select %p942_p8, 1, 0 }
  0x10   : > { %p698_p9 = pneg %p942_p8  ;;  %s24_s26 = ssub.s32 %s873_s15, %s955_s24 }
  0x11   : > { %s762_s27 = scalar_lea.vmem %s132_s22, 2048  ;;  %p770_p3 = scmp.lt.s32.totalorder %s132_s22, %s132_s22 }
  0x12   : > { %p950_p10 = pnand %p698_p9, %p1149_p1  ;;  %p763_p12 = scmp.ne.s32.totalorder %s132_s22, %s762_s27 }
  0x13   : > { %p771_p5 = scmp.lt.s32.totalorder %s762_s27, %s762_s27 }
  0x14   : > { %p753_p11 = pneg %p950_p10 }
  0x15   : > { %p772_p7 = por %p771_p5, %p770_p3 }
  0x16   : > { %p765_p13 = pnand %p763_p12, %p753_p11 }
  0x18   : > { %p766_p0 = pneg %p765_p13 }
  0x1a   : > { %p773_p2 = pnand %p772_p7, %p766_p0 }
  0x1c   : > { %776 = shalt.err (!%p773_p2)
}
  0x1d   : > { %s876_s28 = smov 128   ;;  %s877_s29 = smov 8  }
  0x1e   : > { %701 = dma.hbm_to_vmem [thread:$0]  (!%p950_p10), %s1146_s1, 2048, %s132_s22, [#allocation6], %s876_s28, %s876_s28, %s877_s29  }
  0x1f   : > { %p25_p2 = scmp.eq.s32.totalorder %s24_s26, 0  ;;  %p34_p9 = scmp.ne.s32.totalorder %s869_s14, %s865_s13 }
  0x20   : > { %p35_p11 = scmp.eq.s32.totalorder %s873_s15, 0  ;;  %p711_p12 = scmp.lt.s32.totalorder %s873_s15, 4 }
  0x21   : > { %s975_s5 = scalar_select %p25_p2, %s869_s14, %s27_s25  }
  0x22   : > { %p36_p13 = por %p35_p11, %p34_p9  ;;  %p1157_p0 = scmp.eq.s32.totalorder %s923_s16, 3 }
  0x23   : > { %s148_s7 = sand.u32 1, %s869_s14   ;;  %s568_s8 = sshll.u32 %s873_s15, 11 }
  0x24   : > { %p979_p3 = por %p1157_p0, %p34_p9  ;;  %s555_s9 = sshll.u32 %s148_s7, 7 }
  0x25   : > { %s988_s17 = scalar_lea.hbm %s1145_s0, %s568_s8  ;;  %s152_s21 = scalar_lea.vmem [#allocation2], %s555_s9 }
  0x26   : > { %s1158_s6 = scalar_select %p979_p3, 1, 0 }
  0x27   : > { %s159_s22 = sshll.u32 %s152_s21, 4  ;;  %p990_p10 = pnand %p711_p12, %p36_p13  ;;  %s994_s22 = int_to_ptr.vmem [resolvable:$true] %s159_s22 }
  0x28   : > { %s996_s25 = scalar_lea.sflag [#allocation3], %s148_s7  ;;  %s777_s26 = scalar_lea.hbm %s988_s17, 2048 }
  0x29   : > { %p778_p5 = scmp.ne.s32.totalorder %s988_s17, %s777_s26  ;;  %p779_p7 = pneg %p990_p10 }
  0x2a   : > { %s782_s4 = scalar_lea.hbm %s1145_s0, 8192  ;;  %p783_p11 = scmp.lt.s32.totalorder %s988_s17, %s1145_s0 }
  0x2b   : > { %p780_p2 = pnand %p779_p7, %p778_p5  ;;  %p784_p12 = scmp.lt.s32.totalorder %s782_s4, %s777_s26 }
  0x2d   : > { %p781_p9 = pneg %p780_p2  ;;  %p785_p13 = por %p784_p12, %p783_p11 }
  0x2f   : > { %p786_p0 = pnand %p785_p13, %p781_p9 }
  0x31   : > { %789 = shalt.err (!%p786_p0)
}
  0x32   : > { %s790_s7 = scalar_lea.vmem %s994_s22, 2048  ;;  %s878_s10 = smov [#allocation2]  }
  0x33   : > { %p791_p1 = scmp.ne.s32.totalorder %s994_s22, %s790_s7  ;;  %s795_s11 = sshll.u32 %s878_s10, 4  ;;  %s796_s11 = int_to_ptr.vmem [resolvable:$false] %s795_s11 }
  0x34   : > { %s797_s21 = scalar_lea.vmem %s796_s11, 4096  ;;  %p798_p2 = scmp.lt.s32.totalorder %s994_s22, %s796_s11 }
  0x35   : > { %p793_p6 = pnand %p791_p1, %p779_p7  ;;  %p799_p3 = scmp.lt.s32.totalorder %s797_s21, %s790_s7 }
  0x37   : > { %p794_p5 = pneg %p793_p6  ;;  %p800_p4 = por %p799_p3, %p798_p2 }
  0x39   : > { %p801_p8 = pnand %p800_p4, %p794_p5 }
  0x3b   : > { %804 = shalt.err (!%p801_p8)
}
  0x3c   : > { %705 = dma.hbm_to_vmem [thread:$0]  (!%p990_p10), %s988_s17, 2048, %s994_s22, %s996_s25, %s876_s28, %s876_s28, %s877_s29  }
  0x3d   : > { %p1160_p1 = scmp.ne.s32.totalorder %s1155_s20, 0 }
  0x3e   : > { %s1023_s26 = sand.u32 (!%p1160_p1), 1, %s865_s13   ;;  %p1161_p4 = scmp.ne.s32.totalorder (!%p1160_p1), %s1153_s18, 0 }
  0x3f   : > { %171 = sbr.rel (%p1160_p1) target bundleno = 333 (0x14d), region = 32  ;;  %s559_s27 = sshll.u32 (!%p1160_p1), %s1023_s26, 7 }
  0x40   : > { %s174_s30 = scalar_lea.sflag (!%p1160_p1), [#allocation3], %s1023_s26  ;;  %s1029_s23 = scalar_lea.vmem (!%p1160_p1), [#allocation2], %s559_s27 }
  0x44   : > { %848 = dma.done.wait (%p1161_p4), %s174_s30, 2048  }
  0x45   : > { %850 = vsyncadd (%p1161_p4), %s174_s30, 4294965248  ;;  %p1162_p6 = scmp.eq.s32.totalorder %s923_s16, 0 }
  0x47   : > { %852 = dma.done.wait (%p1162_p6), [#allocation6], 2048   ;;  %p1163_p8 = pmov %p1162_p6 }
  0x48   : > { %v237_v0 = vld [vmem:[#allocation5 + $0x78] sm:$0xff]  ;;  %v236_v1 = vld [vmem:[#allocation5 + $0x70] sm:$0xff]  ;;  %v235_v2 = vld [vmem:[#allocation5 + $0x68] sm:$0xff]  ;;  %s1068_s28 = scalar_lea.vmem [#allocation7], %s559_s27  ;;  %s569_s29 = sshll.u32 %s923_s16, 11 }
  0x49   : > { %854 = vsyncadd (%p1163_p8), [#allocation6], 4294965248  ;;  %602 = vmatprep.subr.mxu0 %v237_v0  ;;  %658 = vmatprep.subr.mxu1 %v237_v0  ;;  %v234_v3 = vld [vmem:[#allocation5 + $0x60] sm:$0xff]  ;;  %v233_v4 = vld [vmem:[#allocation5 + $0x58] sm:$0xff]  ;;  %s468_s17 = sshll.u32 %s1068_s28, 4  ;;  %s1099_s25 = scalar_lea.hbm %s1148_s3, %s569_s29  ;;  %s1101_s17 = int_to_ptr.vmem [resolvable:$true] %s468_s17 }
  0x4a   : > { %603 = vmatpush3.msra.mxu0 %v237_v0  ;;  %674 = vmatpush3.msra.mxu1 %v237_v0  ;;  %v232_v5 = vld [vmem:[#allocation5 + $0x50] sm:$0xff]  ;;  %v231_v6 = vld [vmem:[#allocation5 + $0x48] sm:$0xff]  ;;  %v230_v7 = vld [vmem:[#allocation5 + $0x40] sm:$0xff]  ;;  %s455_s4 = scalar_lea.sflag [#allocation4], %s1023_s26  ;;  %s805_s8 = scalar_lea.vmem %s1101_s17, 2048 }
  0x4b   : > { %604 = vmatprep.subr.mxu0 %v236_v1  ;;  %659 = vmatprep.subr.mxu1 %v236_v1  ;;  %v229_v8 = vld [vmem:[#allocation5 + $0x38] sm:$0xff]  ;;  %v228_v9 = vld [vmem:[#allocation5 + $0x30] sm:$0xff]  ;;  %v227_v10 = vld [vmem:[#allocation5 + $0x28] sm:$0xff]  ;;  %p806_p3 = scmp.ne.s32.totalorder %s1101_s17, %s805_s8  ;;  %p1164_p10 = scmp.ne.s32.totalorder %s1158_s6, 0 }
  0x4c   : > { %605 = vmatpush3.msra.mxu0 %v236_v1  ;;  %675 = vmatpush3.msra.mxu1 %v236_v1  ;;  %v226_v11 = vld [vmem:[#allocation5 + $0x20] sm:$0xff]  ;;  %v225_v12 = vld [vmem:[#allocation5 + $0x18] sm:$0xff]  ;;  %v224_v13 = vld [vmem:[#allocation5 + $0x10] sm:$0xff]  ;;  %s879_s9 = smov [#allocation7]  }
  0x4d   : > { %606 = vmatprep.subr.mxu0 %v235_v2  ;;  %660 = vmatprep.subr.mxu1 %v235_v2  ;;  %v223_v14 = vld [vmem:[#allocation5 + $0x8] sm:$0xff]  ;;  %v222_v15 = vld [vmem:[#allocation5] sm:$0xff]  ;;  %v208_v20 = vld [vmem:[%s1029_s23 + $0x10] sm:$0xff]  ;;  %p807_p7 = pnand %p806_p3, %p1164_p10  ;;  %s809_s7 = sshll.u32 %s879_s9, 4  ;;  %s810_s7 = int_to_ptr.vmem [resolvable:$false] %s809_s7 }
  0x4e   : > { %607 = vmatpush3.msra.mxu0 %v235_v2  ;;  %676 = vmatpush3.msra.mxu1 %v235_v2  ;;  %v206_v16 = vld [vmem:[%s1029_s23] sm:$0xff]  ;;  %v207_v18 = vld [vmem:[%s1029_s23 + $0x8] sm:$0xff]  ;;  %v216_v21 = vld [vmem:[%s1029_s23 + $0x50] sm:$0xff]  ;;  %s811_s10 = scalar_lea.vmem %s810_s7, 4096  ;;  %p812_p11 = scmp.lt.s32.totalorder %s1101_s17, %s810_s7 }
  0x4f   : > { %608 = vmatprep.subr.mxu0 %v234_v3  ;;  %661 = vmatprep.subr.mxu1 %v234_v3  ;;  %v214_v17 = vld [vmem:[%s1029_s23 + $0x40] sm:$0xff]  ;;  %v215_v19 = vld [vmem:[%s1029_s23 + $0x48] sm:$0xff]  ;;  %v209_v22 = vld [vmem:[%s1029_s23 + $0x18] sm:$0xff]  ;;  %p808_p9 = pneg %p807_p7  ;;  %p813_p12 = scmp.lt.s32.totalorder %s811_s10, %s805_s8 }
  0x50   : > { %609 = vmatpush3.msra.mxu0 %v234_v3  ;;  %677 = vmatpush3.msra.mxu1 %v234_v3  ;;  %v217_v23 = vld [vmem:[%s1029_s23 + $0x58] sm:$0xff]  ;;  %v210_v24 = vld [vmem:[%s1029_s23 + $0x20] sm:$0xff]  ;;  %v211_v26 = vld [vmem:[%s1029_s23 + $0x28] sm:$0xff] }
  0x51   : > { %610 = vmatprep.subr.mxu0 %v233_v4  ;;  %662 = vmatprep.subr.mxu1 %v233_v4  ;;  %v218_v25 = vld [vmem:[%s1029_s23 + $0x60] sm:$0xff]  ;;  %v219_v27 = vld [vmem:[%s1029_s23 + $0x68] sm:$0xff]  ;;  %v212_v28 = vld [vmem:[%s1029_s23 + $0x30] sm:$0xff]  ;;  %p814_p13 = por %p813_p12, %p812_p11 }
  0x52   : > { %611 = vmatpush3.msra.mxu0 %v233_v4  ;;  %678 = vmatpush3.msra.mxu1 %v233_v4  ;;  %v220_v29 = vld [vmem:[%s1029_s23 + $0x70] sm:$0xff]  ;;  %v213_v30 = vld [vmem:[%s1029_s23 + $0x38] sm:$0xff]  ;;  %v1058_v32 = vld [vmem:[%s1147_s2] ss:$0 sm:$0xff] }
  0x53   : > { %612 = vmatprep.subr.mxu0 %v232_v5  ;;  %663 = vmatprep.subr.mxu1 %v232_v5  ;;  %v221_v31 = vld [vmem:[%s1029_s23 + $0x78] sm:$0xff]  ;;  %p815_p0 = pnand %p814_p13, %p808_p9 }
  0x54   : > { %613 = vmatpush3.msra.mxu0 %v232_v5  ;;  %679 = vmatpush3.msra.mxu1 %v232_v5 }
  0x55   : > { %614 = vmatprep.subr.mxu0 %v231_v6  ;;  %664 = vmatprep.subr.mxu1 %v231_v6 }
  0x56   : > { %615 = vmatpush3.msra.mxu0 %v231_v6  ;;  %680 = vmatpush3.msra.mxu1 %v231_v6 }
  0x57   : > { %616 = vmatprep.subr.mxu0 %v230_v7  ;;  %665 = vmatprep.subr.mxu1 %v230_v7 }
  0x58   : > { %617 = vmatpush3.msra.mxu0 %v230_v7  ;;  %681 = vmatpush3.msra.mxu1 %v230_v7 }
  0x59   : > { %618 = vmatprep.subr.mxu0 %v229_v8  ;;  %666 = vmatprep.subr.mxu1 %v229_v8 }
  0x5a   : > { %619 = vmatpush3.msra.mxu0 %v229_v8  ;;  %682 = vmatpush3.msra.mxu1 %v229_v8 }
  0x5b   : > { %620 = vmatprep.subr.mxu0 %v228_v9  ;;  %667 = vmatprep.subr.mxu1 %v228_v9 }
  0x5c   : > { %621 = vmatpush3.msra.mxu0 %v228_v9  ;;  %683 = vmatpush3.msra.mxu1 %v228_v9 }
  0x5d   : > { %622 = vmatprep.subr.mxu0 %v227_v10  ;;  %668 = vmatprep.subr.mxu1 %v227_v10 }
  0x5e   : > { %623 = vmatpush3.msra.mxu0 %v227_v10  ;;  %684 = vmatpush3.msra.mxu1 %v227_v10 }
  0x5f   : > { %624 = vmatprep.subr.mxu0 %v226_v11  ;;  %669 = vmatprep.subr.mxu1 %v226_v11 }
  0x60   : > { %625 = vmatpush3.msra.mxu0 %v226_v11  ;;  %685 = vmatpush3.msra.mxu1 %v226_v11 }
  0x61   : > { %626 = vmatprep.subr.mxu0 %v225_v12  ;;  %670 = vmatprep.subr.mxu1 %v225_v12 }
  0x62   : > { %627 = vmatpush3.msra.mxu0 %v225_v12  ;;  %686 = vmatpush3.msra.mxu1 %v225_v12 }
  0x63   : > { %628 = vmatprep.subr.mxu0 %v224_v13  ;;  %671 = vmatprep.subr.mxu1 %v224_v13 }
  0x64   : > { %629 = vmatpush3.msra.mxu0 %v224_v13  ;;  %687 = vmatpush3.msra.mxu1 %v224_v13 }
  0x65   : > { %630 = vmatprep.subr.mxu0 %v223_v14  ;;  %672 = vmatprep.subr.mxu1 %v223_v14 }
  0x66   : > { %631 = vmatpush3.msra.mxu0 %v223_v14  ;;  %688 = vmatpush3.msra.mxu1 %v223_v14 }
  0x67   : > { %632 = vmatprep.subr.mxu0 %v222_v15  ;;  %673 = vmatprep.subr.mxu1 %v222_v15 }
  0x68   : > { %633 = vmatpush3.msra.mxu0 %v222_v15  ;;  %689 = vmatpush3.msra.mxu1 %v222_v15 }
  0x69   : > { %634 = vmatprep.mubr.f32.mxu0 %v206_v16  ;;  %646 = vmatprep.mubr.f32.mxu1 %v214_v17 }
  0x6a   : > { %635 = vmatmul.mubr.f32.vlgmr.msra.gmra.mxu0 %v207_v18  ;;  %647 = vmatmul.mubr.f32.vlgmr.msra.gmra.mxu1 %v215_v19 }
  0x6b   : > { %637 = vmatprep.mubr.f32.mxu0 %v208_v20  ;;  %649 = vmatprep.mubr.f32.mxu1 %v216_v21 }
  0x6e   : > { %638 = vmatmul.mubr.f32.gmra.mxu0 %v209_v22  ;;  %650 = vmatmul.mubr.f32.gmra.mxu1 %v217_v23 }
  0x6f   : > { %640 = vmatprep.mubr.f32.mxu0 %v210_v24  ;;  %652 = vmatprep.mubr.f32.mxu1 %v218_v25 }
  0x72   : > { %641 = vmatmul.mubr.f32.gmra.mxu0 %v211_v26  ;;  %653 = vmatmul.mubr.f32.gmra.mxu1 %v219_v27 }
  0x73   : > { %643 = vmatprep.mubr.f32.mxu0 %v212_v28  ;;  %655 = vmatprep.mubr.f32.mxu1 %v220_v29 }
  0x76   : > { %644 = vmatmul.mubr.f32.gmra.mxu0 %v213_v30  ;;  %656 = vmatmul.mubr.f32.gmra.mxu1 %v221_v31 }
 0x12a   : > { %v636_v33 = vpop.f32.mrf.mxu0  ;;  %v648_v34 = vpop.f32.mrf.mxu1 }
 0x12b   : > { %v317_v35 = vadd.f32 %v636_v33, %v1058_v32  ;;  %v357_v36 = vadd.f32 %v648_v34, %v1058_v32 }
 0x12c   : > { %v311_v37 = vpop.f32.mrf.mxu0  ;;  %v351_v38 = vpop.f32.mrf.mxu1 }
 0x12d   : > { %vm391_vm0 = vcmp.gt.f32.partialorder %v317_v35, 0.0  ;;  %v407_v39 = vmul.f32 0.1, %v317_v35  ;;  %vm399_vm1 = vcmp.gt.f32.partialorder %v357_v36, 0.0  ;;  %v415_v40 = vmul.f32 0.1, %v357_v36 }
 0x12e   : > { %v312_v41 = vadd.f32 %v1058_v32, %v311_v37  ;;  %v352_v42 = vadd.f32 %v1058_v32, %v351_v38  ;;  %v639_v43 = vpop.f32.mrf.mxu0  ;;  %v651_v44 = vpop.f32.mrf.mxu1 }
 0x12f   : > { %v423_v45 = vsel %vm391_vm0, %v317_v35, %v407_v39  ;;  %v431_v46 = vsel %vm399_vm1, %v357_v36, %v415_v40  ;;  %v327_v47 = vadd.f32 %v639_v43, %v1058_v32  ;;  %v367_v48 = vadd.f32 %v651_v44, %v1058_v32 }
 0x130   : > { %439 = vst [vmem:[%s1068_s28 + $0x8] sm:$0xff] %v423_v45  ;;  %447 = vst [vmem:[%s1068_s28 + $0x48] sm:$0xff] %v431_v46  ;;  %vm390_vm2 = vcmp.gt.f32.partialorder %v312_v41, 0.0  ;;  %v406_v49 = vmul.f32 0.1, %v312_v41  ;;  %vm398_vm3 = vcmp.gt.f32.partialorder %v352_v42, 0.0  ;;  %v321_v51 = vpop.f32.mrf.mxu0  ;;  %v361_v52 = vpop.f32.mrf.mxu1 }
 0x131   : > { %v414_v50 = vmul.f32 0.1, %v352_v42  ;;  %vm393_vm4 = vcmp.gt.f32.partialorder %v327_v47, 0.0  ;;  %v409_v53 = vmul.f32 0.1, %v327_v47  ;;  %vm401_vm5 = vcmp.gt.f32.partialorder %v367_v48, 0.0 }
 0x132   : > { %v417_v54 = vmul.f32 0.1, %v367_v48  ;;  %v422_v55 = vsel %vm390_vm2, %v312_v41, %v406_v49  ;;  %v322_v57 = vadd.f32 %v1058_v32, %v321_v51  ;;  %v362_v58 = vadd.f32 %v1058_v32, %v361_v52  ;;  %v642_v59 = vpop.f32.mrf.mxu0  ;;  %v654_v60 = vpop.f32.mrf.mxu1 }
 0x133   : > { %v430_v56 = vsel %vm398_vm3, %v352_v42, %v414_v50  ;;  %438 = vst [vmem:[%s1068_s28] sm:$0xff] %v422_v55  ;;  %v425_v61 = vsel %vm393_vm4, %v327_v47, %v409_v53  ;;  %v337_v63 = vadd.f32 %v642_v59, %v1058_v32  ;;  %v377_v0 = vadd.f32 %v654_v60, %v1058_v32 }
 0x134   : > { %446 = vst [vmem:[%s1068_s28 + $0x40] sm:$0xff] %v430_v56  ;;  %v433_v62 = vsel %vm401_vm5, %v367_v48, %v417_v54  ;;  %441 = vst [vmem:[%s1068_s28 + $0x18] sm:$0xff] %v425_v61  ;;  %vm392_vm6 = vcmp.gt.f32.partialorder %v322_v57, 0.0  ;;  %v408_v1 = vmul.f32 0.1, %v322_v57  ;;  %vm400_vm7 = vcmp.gt.f32.partialorder %v362_v58, 0.0  ;;  %v331_v3 = vpop.f32.mrf.mxu0  ;;  %v371_v4 = vpop.f32.mrf.mxu1 }
 0x135   : > { %449 = vst [vmem:[%s1068_s28 + $0x58] sm:$0xff] %v433_v62  ;;  %v416_v2 = vmul.f32 0.1, %v362_v58  ;;  %vm395_vm8 = vcmp.gt.f32.partialorder %v337_v63, 0.0  ;;  %v411_v5 = vmul.f32 0.1, %v337_v63  ;;  %v332_v9 = vadd.f32 %v1058_v32, %v331_v3 }
 0x136   : > { %vm403_vm9 = vcmp.gt.f32.partialorder %v377_v0, 0.0  ;;  %v419_v6 = vmul.f32 0.1, %v377_v0  ;;  %v424_v7 = vsel %vm392_vm6, %v322_v57, %v408_v1  ;;  %v372_v10 = vadd.f32 %v1058_v32, %v371_v4  ;;  %v645_v11 = vpop.f32.mrf.mxu0  ;;  %v657_v12 = vpop.f32.mrf.mxu1 }
 0x137   : > { %v432_v8 = vsel %vm400_vm7, %v362_v58, %v416_v2  ;;  %440 = vst [vmem:[%s1068_s28 + $0x10] sm:$0xff] %v424_v7  ;;  %v427_v13 = vsel %vm395_vm8, %v337_v63, %v411_v5  ;;  %v347_v15 = vadd.f32 %v645_v11, %v1058_v32  ;;  %v387_v16 = vadd.f32 %v657_v12, %v1058_v32 }
 0x138   : > { %448 = vst [vmem:[%s1068_s28 + $0x50] sm:$0xff] %v432_v8  ;;  %v435_v14 = vsel %vm403_vm9, %v377_v0, %v419_v6  ;;  %443 = vst [vmem:[%s1068_s28 + $0x28] sm:$0xff] %v427_v13  ;;  %vm394_vm10 = vcmp.gt.f32.partialorder %v332_v9, 0.0  ;;  %v410_v17 = vmul.f32 0.1, %v332_v9  ;;  %vm402_vm11 = vcmp.gt.f32.partialorder %v372_v10, 0.0  ;;  %v341_v19 = vpop.f32.mrf.mxu0  ;;  %v381_v20 = vpop.f32.mrf.mxu1 }
 0x139   : > { %451 = vst [vmem:[%s1068_s28 + $0x68] sm:$0xff] %v435_v14  ;;  %v418_v18 = vmul.f32 0.1, %v372_v10  ;;  %vm397_vm12 = vcmp.gt.f32.partialorder %v347_v15, 0.0  ;;  %v413_v21 = vmul.f32 0.1, %v347_v15  ;;  %v342_v25 = vadd.f32 %v1058_v32, %v341_v19 }
 0x13a   : > { %vm405_vm13 = vcmp.gt.f32.partialorder %v387_v16, 0.0  ;;  %v421_v22 = vmul.f32 0.1, %v387_v16  ;;  %v426_v23 = vsel %vm394_vm10, %v332_v9, %v410_v17  ;;  %v382_v26 = vadd.f32 %v1058_v32, %v381_v20 }
 0x13b   : > { %v434_v24 = vsel %vm402_vm11, %v372_v10, %v418_v18  ;;  %442 = vst [vmem:[%s1068_s28 + $0x20] sm:$0xff] %v426_v23  ;;  %v429_v27 = vsel %vm397_vm12, %v347_v15, %v413_v21  ;;  %vm396_vm14 = vcmp.gt.f32.partialorder %v342_v25, 0.0  ;;  %v412_v29 = vmul.f32 0.1, %v342_v25 }
 0x13c   : > { %450 = vst [vmem:[%s1068_s28 + $0x60] sm:$0xff] %v434_v24  ;;  %v437_v28 = vsel %vm405_vm13, %v387_v16, %v421_v22  ;;  %445 = vst [vmem:[%s1068_s28 + $0x38] sm:$0xff] %v429_v27  ;;  %vm404_vm15 = vcmp.gt.f32.partialorder %v382_v26, 0.0  ;;  %v420_v30 = vmul.f32 0.1, %v382_v26 }
 0x13d   : > { %453 = vst [vmem:[%s1068_s28 + $0x78] sm:$0xff] %v437_v28  ;;  %v428_v31 = vsel %vm396_vm14, %v342_v25, %v412_v29 }
 0x13e   : > { %v436_v32 = vsel %vm404_vm15, %v382_v26, %v420_v30  ;;  %444 = vst [vmem:[%s1068_s28 + $0x30] sm:$0xff] %v428_v31 }
 0x13f   : > { %452 = vst [vmem:[%s1068_s28 + $0x70] sm:$0xff] %v436_v32 }
 0x140   : > { %818 = shalt.err (!%p815_p0)
}
 0x141   : > { %s819_s11 = scalar_lea.hbm %s1099_s25, 2048  ;;  %s823_s30 = scalar_lea.hbm %s1148_s3, 8192 }
 0x142   : > { %p820_p5 = scmp.ne.s32.totalorder %s1099_s25, %s819_s11  ;;  %p824_p4 = scmp.lt.s32.totalorder %s1099_s25, %s1148_s3 }
 0x143   : > { %p825_p6 = scmp.lt.s32.totalorder %s823_s30, %s819_s11 }
 0x144   : > { %p821_p2 = pnand %p820_p5, %p1164_p10 }
 0x145   : > { %p826_p8 = por %p825_p6, %p824_p4 }
 0x146   : > { %p822_p1 = pneg %p821_p2 }
 0x148   : > { %p827_p3 = pnand %p826_p8, %p822_p1 }
 0x14a   : > { %830 = shalt.err (!%p827_p3)
}
 0x14b   : > { %s880_s20 = smov 128   ;;  %s881_s28 = smov 8  }
 0x14c   : > { %696 = dma.vmem_to_hbm [thread:$0]  (%p1164_p10), %s1101_s17, 2048, %s1099_s25, %s455_s4, %s880_s20, %s880_s20, %s881_s28  }
 0x14d PF: > { %p713_p7 = scmp.ge.s32.totalorder %s873_s15, 2  ;;  %s483_s29 = sand.u32 1, %s861_s12  }
 0x14e   : > { %p1165_p9 = scmp.ne.s32.totalorder %s1154_s19, 0  ;;  %s484_s16 = scalar_lea.sflag [#allocation4], %s483_s29 }
 0x150   : > { %p707_p11 = pnand %p713_p7, %p1165_p9 }
 0x152   : > { %p708_p12 = pneg %p707_p11 }
 0x154   : > { %856 = dma.done.wait (%p708_p12), %s484_s16, 2048  }
 0x155   : > { %858 = vsyncadd (%p708_p12), %s484_s16, 4294965248  ;;  %p17_p13 = scmp.ge.s32.totalorder %s955_s24, 6   ;;  %s1166_s12 = smov %s865_s13 }
 0x156   : > { %s1167_s13 = smov %s869_s14  ;;  %s1168_s14 = smov %s975_s5 }
 0x157   : > { %s1169_s15 = smov %s955_s24  ;;  %19 = sbr.rel (!%p17_p13) target bundleno = 6 (0x6), region = 81 }
 0x15c   :  { %489 = vsyncpa [#allocation3], 1 }
 0x15d   :  { %491 = vsyncpa [#allocation3 + $0x1], 1 }
 0x15e   :  { %492 = vsyncpa [#allocation6], 1 }
 0x15f   :  { %493 = vsyncpa [#allocation4], 1 }
 0x160   :  { %495 = vsyncpa [#allocation4 + $0x1], 1 }

</bundles_post_ra>
